<compile_context>
chip_gen: v7x
topology: tpu7x:2x2x1
jax: 0.10.0
libtpu: 0.0.40
codegen_flags: <defaults>
</compile_context>

<pallas_src>
import jax
import jax.numpy as jnp
import numpy as np
from jax.experimental import pallas as pl
from jax.experimental.pallas import tpu as pltpu

EXPANSION = 4
BN_EPS = 1e-5
LANE = 128   # vreg lane width; every channel dim is padded to this
WL = 16      # left/right spatial pad in the conv2 scratch: 16 keeps the
             # interior write and the dx=1 tap aligned to bf16 (16,128) tiles


def _round_up(x, m):
    return ((x + m - 1) // m) * m


def _vmem_limit_bytes(frac=0.85):
    """Generation-aware VMEM budget: physical capacity minus ~15% headroom."""
    try:
        cap = getattr(pltpu.get_tpu_info(), "vmem_capacity_bytes", None)
    except Exception:
        cap = None
    if not cap:
        cap = 64 * 2 ** 20          # conservative fallback (v7x per-core size)
    return int(cap * frac)


def _bn_affine(ssum, ssq, gamma, beta, count):
    """Fold training-mode BN (batch mean, biased variance) into y*a + b."""
    mean = ssum / count
    var = ssq / count - mean * mean
    a = gamma.reshape(-1) * jax.lax.rsqrt(var + BN_EPS)
    b = beta.reshape(-1) - mean * a
    return a.reshape(1, -1), b.reshape(1, -1)


def bottleneck_forward(x_nhwc, params):
    """Run the Bottleneck block.  x_nhwc: (N, H, W, Cin) f32 -> (N, H, W, 4P) f32."""
    N, H, W, Cin = x_nhwc.shape
    P = params["w1"].shape[1]
    C4 = EXPANSION * P
    assert W % 16 == 0, "W must be a multiple of 16 (bf16 sublane tile)"

    Cp = _round_up(Cin, LANE)
    Pp = _round_up(P, LANE)
    C4p = _round_up(C4, LANE)
    Ctot = Pp + C4p
    R = N * H * W

    # One sample per grid step: the 3x3 conv's spatial halo stays inside a tile
    # and Pallas double-buffers the streamed activation blocks.
    NB = 1
    T = N // NB
    RB = NB * H * W
    WPAD = W + 2 * WL
    bf16, f32 = jnp.bfloat16, jnp.float32

    def pad2(w, r, c):
        return jnp.pad(w, ((0, r - w.shape[0]), (0, c - w.shape[1])))

    def pad_row(v, c, fill):
        return jnp.pad(v, ((0, 0), (0, c - v.shape[1])), constant_values=fill)

    # ---- host-side prep: lane-dense channel padding, bf16 conv weights -----
    x2d = jnp.pad(x_nhwc.reshape(R, Cin), ((0, 0), (0, Cp - Cin))).astype(bf16)
    w1 = pad2(params["w1"], Cp, Pp)
    ws = pad2(params["ws"], Cp, C4p)
    wf = jnp.concatenate([w1, ws], axis=1).astype(bf16)      # fused [conv1|shortcut]
    w2 = jnp.pad(params["w2"],
                 ((0, 0), (0, Pp - P), (0, Pp - P))).astype(bf16)   # (9, Pp, Pp)
    w3 = pad2(params["w3"], Pp, C4p).astype(bf16)
    g1 = pad_row(params["g1"], Pp, 1.0); b1 = pad_row(params["b1"], Pp, 0.0)
    g2 = pad_row(params["g2"], Pp, 1.0); b2 = pad_row(params["b2"], Pp, 0.0)
    g3 = pad_row(params["g3"], C4p, 1.0); b3 = pad_row(params["b3"], C4p, 0.0)
    gs = pad_row(params["gs"], C4p, 1.0); bs = pad_row(params["bs"], C4p, 0.0)

    cparams = pltpu.CompilerParams(
        dimension_semantics=("parallel",),        # v7x: 2 TCs split the tiles
        vmem_limit_bytes=_vmem_limit_bytes())

    def row_spec(c):                 # streamed per-tile activation block
        return pl.BlockSpec((RB, c), lambda i: (i, 0))

    def const2(shape):               # VMEM-resident weights / BN rows
        return pl.BlockSpec(shape, lambda i: (0, 0))

    def stat_spec(c):                # per-tile partial BN sums
        return pl.BlockSpec((1, 8, 2 * c), lambda i: (i, 0, 0))

    def stats_row(y):
        # per-tile [sum | sum of squares] on the VPU/XLU (keeps the MXU free)
        return jnp.concatenate([jnp.sum(y, axis=0, keepdims=True),
                                jnp.sum(y * y, axis=0, keepdims=True)], axis=1)

    # ------------- stage A: fused conv1 + shortcut 1x1 matmul ---------------
    def stage_a(x_ref, wf_ref, t1_ref, ts_ref, st_ref):
        t = jnp.dot(x_ref[...], wf_ref[...], preferred_element_type=f32)
        t1_ref[...] = t[:, :Pp]
        ts_ref[...] = t[:, Pp:]
        st_ref[...] = jnp.broadcast_to(stats_row(t),
                                       (8, 2 * Ctot)).reshape(1, 8, 2 * Ctot)

    t1, tsc, st_a = pl.pallas_call(
        stage_a,
        out_shape=(jax.ShapeDtypeStruct((R, Pp), f32),
                   jax.ShapeDtypeStruct((R, C4p), f32),
                   jax.ShapeDtypeStruct((T, 8, 2 * Ctot), f32)),
        grid=(T,),
        in_specs=[row_spec(Cp), const2((Cp, Ctot))],
        out_specs=(row_spec(Pp), row_spec(C4p), stat_spec(Ctot)),
        compiler_params=cparams,
    )(x2d, wf)

    s_a = jnp.sum(st_a[:, 0, :], axis=0)
    a1, c1 = _bn_affine(s_a[:Pp], s_a[Ctot:Ctot + Pp], g1, b1, R)
    asc, csc = _bn_affine(s_a[Pp:Ctot], s_a[Ctot + Pp:], gs, bs, R)

    # -------- stage B: bn1+relu, 3x3 conv as 9 accumulated MXU dots ---------
    def stage_b(t1_ref, a_ref, b_ref, w2_ref, u2_ref, st_ref, pad_ref):
        o1 = jnp.maximum(t1_ref[...] * a_ref[...] + b_ref[...], 0.0)
        # bf16 halo scratch; halo re-zeroed and interior fully overwritten on
        # EVERY grid step (scratch persists across steps); zero fills are full
        # 16-wide sublane tiles -> unmasked stores.
        pad_ref[:, 0:1, :, :] = jnp.zeros((NB, 1, WPAD, Pp), bf16)
        pad_ref[:, H + 1:H + 2, :, :] = jnp.zeros((NB, 1, WPAD, Pp), bf16)
        pad_ref[:, :, 0:WL, :] = jnp.zeros((NB, H + 2, WL, Pp), bf16)
        pad_ref[:, :, WL + W:WPAD, :] = jnp.zeros((NB, H + 2, WL, Pp), bf16)
        pad_ref[:, 1:H + 1, WL:WL + W, :] = (
            o1.astype(bf16).reshape(NB, H, W, Pp))
        acc = jnp.zeros((RB, Pp), f32)
        for dy in range(3):
            for dx in range(3):
                tap = pad_ref[:, dy:dy + H, WL - 1 + dx:WL - 1 + dx + W, :]
                acc = acc + jnp.dot(tap.reshape(RB, Pp), w2_ref[dy * 3 + dx],
                                    preferred_element_type=f32)
        u2_ref[...] = acc
        st_ref[...] = jnp.broadcast_to(stats_row(acc),
                                       (8, 2 * Pp)).reshape(1, 8, 2 * Pp)

    u2, st_b = pl.pallas_call(
        stage_b,
        out_shape=(jax.ShapeDtypeStruct((R, Pp), f32),
                   jax.ShapeDtypeStruct((T, 8, 2 * Pp), f32)),
        grid=(T,),
        in_specs=[row_spec(Pp), const2((1, Pp)), const2((1, Pp)),
                  pl.BlockSpec((9, Pp, Pp), lambda i: (0, 0, 0))],
        out_specs=(row_spec(Pp), stat_spec(Pp)),
        scratch_shapes=[pltpu.VMEM((NB, H + 2, WPAD, Pp), bf16)],
        compiler_params=cparams,
    )(t1, a1, c1, w2)

    s_b = jnp.sum(st_b[:, 0, :], axis=0)
    a2, c2 = _bn_affine(s_b[:Pp], s_b[Pp:], g2, b2, R)

    # ------------------- stage C: bn2+relu, conv3 1x1 -----------------------
    def stage_c(u2_ref, a_ref, b_ref, w3_ref, u3_ref, st_ref):
        o2 = jnp.maximum(u2_ref[...] * a_ref[...] + b_ref[...], 0.0)
        u3 = jnp.dot(o2.astype(bf16), w3_ref[...], preferred_element_type=f32)
        u3_ref[...] = u3
        st_ref[...] = jnp.broadcast_to(stats_row(u3),
                                       (8, 2 * C4p)).reshape(1, 8, 2 * C4p)

    u3, st_c = pl.pallas_call(
        stage_c,
        out_shape=(jax.ShapeDtypeStruct((R, C4p), f32),
                   jax.ShapeDtypeStruct((T, 8, 2 * C4p), f32)),
        grid=(T,),
        in_specs=[row_spec(Pp), const2((1, Pp)), const2((1, Pp)),
                  const2((Pp, C4p))],
        out_specs=(row_spec(C4p), stat_spec(C4p)),
        compiler_params=cparams,
    )(u2, a2, c2, w3)

    s_c = jnp.sum(st_c[:, 0, :], axis=0)
    a3, c3 = _bn_affine(s_c[:C4p], s_c[C4p:], g3, b3, R)

    # ---------- stage D: bn3 + bn_sc + residual add + final relu ------------
    # TODO(synk): emit bf16 here if the downstream consumer accepts it
    #             (halves the output writeback).
    def stage_d(u3_ref, ts_ref, a3_ref, c3_ref, as_ref, cs_ref, o_ref):
        y = u3_ref[...] * a3_ref[...] + c3_ref[...]
        s = ts_ref[...] * as_ref[...] + cs_ref[...]
        o_ref[...] = jnp.maximum(y + s, 0.0)

    out2d = pl.pallas_call(
        stage_d,
        out_shape=jax.ShapeDtypeStruct((R, C4p), f32),
        grid=(T,),
        in_specs=[row_spec(C4p), row_spec(C4p),
                  const2((1, C4p)), const2((1, C4p)),
                  const2((1, C4p)), const2((1, C4p))],
        out_specs=row_spec(C4p),
        compiler_params=cparams,
    )(u3, tsc, a3, c3, asc, csc)

    return out2d[:, :C4].reshape(N, H, W, C4)


def init_params(key, in_planes, planes):
    """Deterministic synthetic parameters (matmul layout: (Cin, Cout))."""
    ks = jax.random.split(key, 8)
    p4 = EXPANSION * planes
    f = jnp.float32
    return {
        # conv weights in (in, out) matmul layout; w2 taps ordered dy*3+dx
        "w1": 0.3 * jax.random.normal(ks[0], (in_planes, planes), f),
        "w2": 0.3 * jax.random.normal(ks[1], (9, planes, planes), f),
        "w3": 0.3 * jax.random.normal(ks[2], (planes, p4), f),
        "ws": 0.3 * jax.random.normal(ks[3], (in_planes, p4), f),
        # BN affine params as (1, C) rows
        "g1": 1.0 + 0.1 * jax.random.normal(ks[4], (1, planes), f),
        "b1": 0.1 * jax.random.normal(ks[5], (1, planes), f),
        "g2": 1.0 + 0.1 * jax.random.normal(ks[6], (1, planes), f),
        "b2": 0.1 * jax.random.normal(ks[7], (1, planes), f),
        "g3": jnp.ones((1, p4), f),
        "b3": jnp.zeros((1, p4), f),
        "gs": jnp.ones((1, p4), f),
        "bs": jnp.zeros((1, p4), f),
    }


def reference_forward(x_nhwc, params):
    """Pure-JAX reference with the same mixed-precision policy as the kernel
    (bf16 matmul operands, f32 accumulation, f32 training-mode BN)."""
    N, H, W, Cin = x_nhwc.shape
    P = params["w1"].shape[1]
    bf16 = jnp.bfloat16

    def mm(a, w):
        return jnp.einsum("nhwc,co->nhwo", a.astype(bf16), w.astype(bf16),
                          preferred_element_type=jnp.float32)

    def bn(y, g, b, relu):
        m = jnp.mean(y, axis=(0, 1, 2), keepdims=True)
        v = jnp.mean((y - m) ** 2, axis=(0, 1, 2), keepdims=True)
        z = (y - m) * jax.lax.rsqrt(v + BN_EPS) * g.reshape(1, 1, 1, -1) \
            + b.reshape(1, 1, 1, -1)
        return jnp.maximum(z, 0.0) if relu else z

    o1 = bn(mm(x_nhwc, params["w1"]), params["g1"], params["b1"], True)

    p = jnp.pad(o1, ((0, 0), (1, 1), (1, 1), (0, 0)))
    o2 = jnp.zeros((N, H, W, P), jnp.float32)
    for dy in range(3):
        for dx in range(3):
            o2 = o2 + mm(p[:, dy:dy + H, dx:dx + W, :],
                         params["w2"][dy * 3 + dx])
    o2 = bn(o2, params["g2"], params["b2"], True)

    o3 = bn(mm(o2, params["w3"]), params["g3"], params["b3"], False)
    sc = bn(mm(x_nhwc, params["ws"]), params["gs"], params["bs"], False)
    return jnp.maximum(o3 + sc, 0.0)


if __name__ == "__main__":
    N, H, W = 2, 16, 16
    in_planes, planes = 4, 8          # output channels = expansion*planes = 32

    key = jax.random.PRNGKey(0)
    kx, kp = jax.random.split(key)
    x_nhwc = jax.random.normal(kx, (N, H, W, in_planes), jnp.float32)
    params = init_params(kp, in_planes, planes)

    out = jax.block_until_ready(bottleneck_forward(x_nhwc, params))
    ref = jax.block_until_ready(reference_forward(x_nhwc, params))

    assert out.shape == (N, H, W, EXPANSION * planes), out.shape
    out_np, ref_np = np.asarray(out), np.asarray(ref)
    if not np.allclose(out_np, ref_np, rtol=1e-2, atol=1e-2):
        raise AssertionError(
            "Pallas kernel mismatch vs JAX reference, max abs err = "
            f"{np.max(np.abs(out_np - ref_np))}")

    print("KERNEL_OK")
</pallas_src>

<mosaic_0001>
module attributes {stable_mosaic.version = 11 : i64} {
  func.func @stage_a(%arg0: i32, %arg1: memref<256x128xbf16, #tpu.memory_space<vmem>>, %arg2: memref<128x256xbf16, #tpu.memory_space<vmem>>, %arg3: memref<256x128xf32, #tpu.memory_space<vmem>>, %arg4: memref<256x128xf32, #tpu.memory_space<vmem>>, %arg5: memref<1x8x512xf32, #tpu.memory_space<vmem>>) attributes {dimension_semantics = [#tpu.dimension_semantics<parallel>], iteration_bounds = array<i64: 2>, scalar_prefetch = 0 : i64, scratch_operands = 0 : i64, tpu.core_type = #tpu.core_type<tc>, window_params = [{transform_indices = @transform_0, window_bounds = array<i64: 256, 128>}, {pipeline_mode = #tpu.pipeline_mode<synchronous>, transform_indices = @transform_1, window_bounds = array<i64: 128, 256>}, {transform_indices = @transform_2, window_bounds = array<i64: 256, 128>}, {transform_indices = @transform_3, window_bounds = array<i64: 256, 128>}, {transform_indices = @transform_4, window_bounds = array<i64: 1, 8, 512>}]} {
    %c0 = arith.constant 0 : index
    %c0_0 = arith.constant 0 : index
    %0 = vector.load %arg1[%c0, %c0_0] : memref<256x128xbf16, #tpu.memory_space<vmem>>, vector<256x128xbf16>
    %c0_1 = arith.constant 0 : index
    %c0_2 = arith.constant 0 : index
    %1 = vector.load %arg2[%c0_1, %c0_2] : memref<128x256xbf16, #tpu.memory_space<vmem>>, vector<128x256xbf16>
    %cst = arith.constant dense<0.000000e+00> : vector<256x256xf32>
    %2 = tpu.matmul %0, %1, %cst {dimension_numbers = #tpu.dot_dimension_numbers<[1], [0], [0], [1], [0, 0, 1, 1], [], []>} : vector<256x128xbf16>, vector<128x256xbf16>, vector<256x256xf32> -> vector<256x256xf32>
    %3 = vector.extract_strided_slice %2 {offsets = [0, 0], sizes = [256, 128], strides = [1, 1]} : vector<256x256xf32> to vector<256x128xf32>
    %c0_3 = arith.constant 0 : index
    %c0_4 = arith.constant 0 : index
    %4 = vector.load %arg3[%c0_3, %c0_4] : memref<256x128xf32, #tpu.memory_space<vmem>>, vector<256x128xf32>
    tpu.vector_store %arg3[%c0_3, %c0_4], %3 {strides = array<i32>} : memref<256x128xf32, #tpu.memory_space<vmem>>, vector<256x128xf32>,
    %5 = vector.extract_strided_slice %2 {offsets = [0, 128], sizes = [256, 128], strides = [1, 1]} : vector<256x256xf32> to vector<256x128xf32>
    %c0_5 = arith.constant 0 : index
    %c0_6 = arith.constant 0 : index
    %6 = vector.load %arg4[%c0_5, %c0_6] : memref<256x128xf32, #tpu.memory_space<vmem>>, vector<256x128xf32>
    tpu.vector_store %arg4[%c0_5, %c0_6], %5 {strides = array<i32>} : memref<256x128xf32, #tpu.memory_space<vmem>>, vector<256x128xf32>,
    %cst_7 = arith.constant dense<0.000000e+00> : vector<256xf32>
    %7 = vector.multi_reduction <add>, %2, %cst_7 [0] : vector<256x256xf32> to vector<256xf32>
    %8 = vector.shape_cast %7 : vector<256xf32> to vector<1x256xf32>
    %9 = arith.mulf %2, %2 : vector<256x256xf32>
    %cst_8 = arith.constant dense<0.000000e+00> : vector<256xf32>
    %10 = vector.multi_reduction <add>, %9, %cst_8 [0] : vector<256x256xf32> to vector<256xf32>
    %11 = vector.shape_cast %10 : vector<256xf32> to vector<1x256xf32>
    %12 = tpu.concatenate %8, %11 in 1 : vector<1x256xf32>, vector<1x256xf32> -> vector<1x512xf32>
    %13 = vector.shape_cast %12 : vector<1x512xf32> to vector<1x512xf32>
    %14 = vector.broadcast %13 : vector<1x512xf32> to vector<8x512xf32>
    %15 = vector.shape_cast %14 : vector<8x512xf32> to vector<1x8x512xf32>
    %c0_9 = arith.constant 0 : index
    %c0_10 = arith.constant 0 : index
    %c0_11 = arith.constant 0 : index
    %16 = vector.load %arg5[%c0_9, %c0_10, %c0_11] : memref<1x8x512xf32, #tpu.memory_space<vmem>>, vector<1x8x512xf32>
    tpu.vector_store %arg5[%c0_9, %c0_10, %c0_11], %15 {strides = array<i32>} : memref<1x8x512xf32, #tpu.memory_space<vmem>>, vector<1x8x512xf32>,
    return
  }
  func.func @transform_0(%arg0: i32) -> (i32, i32) {
    %c0_i32 = arith.constant 0 : i32
    %c0_i32_0 = arith.constant 0 : i32
    return %arg0, %c0_i32 : i32, i32
  }
  func.func @transform_1(%arg0: i32) -> (i32, i32) {
    %c0_i32 = arith.constant 0 : i32
    %c0_i32_0 = arith.constant 0 : i32
    %c0_i32_1 = arith.constant 0 : i32
    return %c0_i32, %c0_i32_0 : i32, i32
  }
  func.func @transform_2(%arg0: i32) -> (i32, i32) {
    %c0_i32 = arith.constant 0 : i32
    %c0_i32_0 = arith.constant 0 : i32
    return %arg0, %c0_i32 : i32, i32
  }
  func.func @transform_3(%arg0: i32) -> (i32, i32) {
    %c0_i32 = arith.constant 0 : i32
    %c0_i32_0 = arith.constant 0 : i32
    return %arg0, %c0_i32 : i32, i32
  }
  func.func @transform_4(%arg0: i32) -> (i32, i32, i32) {
    %c0_i32 = arith.constant 0 : i32
    %c0_i32_0 = arith.constant 0 : i32
    %c0_i32_1 = arith.constant 0 : i32
    return %arg0, %c0_i32, %c0_i32_0 : i32, i32, i32
  }
}

</mosaic_0001>

<bundles_post_ra>
// kernel: tpu_custom_call.1
= control target key start
LH: loop header
LB: loop body
LE: loop exit
PB: predicated region body
PF: predicated region fallthrough
CT: control target
= control target key end

     0   :  { %10 = vsyncpa [#allocation3], 0  ;;  %s2163_s0 = inlined_call_operand.hbm [shape: bf16[512,128], index: 0, kind: input, shape index: {}]   ;;  %s2164_s1 = inlined_call_operand.hbm [shape: bf16[128,256], index: 1, kind: input, shape index: {}]   ;;  %s2165_s2 = inlined_call_operand.hbm [shape: f32[512,128], index: 2, kind: output, shape index: {0}]   ;;  %s2166_s3 = inlined_call_operand.hbm [shape: f32[512,128], index: 3, kind: output, shape index: {1}]   ;;  %s2167_s4 = inlined_call_operand.hbm [shape: f32[2,8,512], index: 4, kind: output, shape index: {2}]  }
   0x1   :  { %12 = vsyncpa [#allocation3 + $0x1], 0 }
   0x2   :  { %13 = vsyncpa [#allocation6], 0 }
   0x3   :  { %14 = vsyncpa [#allocation4], 0 }
   0x4   :  { %16 = vsyncpa [#allocation4 + $0x1], 0 }
   0x5   :  { %17 = vsyncpa [#allocation9], 0 }
   0x6   :  { %19 = vsyncpa [#allocation9 + $0x1], 0  ;;  %s1581_s15 = smov 0   ;;  %s1583_s16 = smov 0  }
   0x7   :  { %s1585_s17 = smov 0   ;;  %s1587_s18 = smov 0  }
   0x8 LB: > { %s1602_s19 = sadd.s32 4294967295, %s1542_s18   ;;  %s1164_s20 = sadd.s32 4294967294, %s1542_s18   ;;  %s1542_s18 = sphi %s1587_s18, %s2187_s18   ;;  %s1538_s17 = sphi %s1585_s17, %s2186_s17   ;;  %s1534_s16 = sphi %s1583_s16, %s2185_s16   ;;  %s1530_s15 = sphi %s1581_s15, %s2184_s15  }
   0x9   : > { %p45_p0 = scmp.ne.s32.totalorder %s1534_s16, %s1530_s15  ;;  %p2168_p1 = scmp.eq.s32.totalorder %s1602_s19, 0 }
   0xa   : > { %p96_p3 = scmp.eq.s32.totalorder %s1164_s20, 1  ;;  %p1165_p5 = scmp.ge.s32.totalorder %s1542_s18, 1 }
   0xb   : > { %p1613_p4 = por %p2168_p1, %p45_p0  ;;  %p155_p7 = scmp.lt.s32.totalorder %s1542_s18, 3 }
   0xc   : > { %p1618_p6 = por %p96_p3, %p45_p0  ;;  %s1544_s24 = smov [#allocation5]  }
   0xd   : > { %s2171_s21 = scalar_select %p1613_p4, 1, 0 }
   0xe   : > { %s2172_s22 = scalar_select %p1618_p6, 1, 0 }
   0xf   : > { %p1623_p8 = pnand %p1165_p5, %p155_p7  ;;  %s167_s25 = sshll.u32 %s1544_s24, 4  ;;  %s1627_s25 = int_to_ptr.vmem [resolvable:$true] %s167_s25 }
  0x10   : > { %s1639_s27 = sadd.s32 1, %s1542_s18   ;;  %s32_s28 = sadd.s32 1, %s1538_s17 }
  0x11   : > { %s2173_s23 = scalar_select %p1623_p8, 1, 0 }
  0x12   : > { %p1252_p9 = pneg %p1623_p8  ;;  %s29_s29 = ssub.s32 %s1542_s18, %s1639_s27 }
  0x13   : > { %s1354_s6 = scalar_lea.hbm %s2164_s1, 2048 }
  0x14   : > { %p1634_p11 = pnand %p1252_p9, %p2168_p1  ;;  %p1355_p12 = scmp.ne.s32.totalorder %s2164_s1, %s1354_s6 }
  0x15   : > { %p1361_p5 = scmp.lt.u32.totalorder %s1354_s6, %s2164_s1 }
  0x16   : > { %p1356_p13 = pneg %p1634_p11 }
  0x18   : > { %p1357_p0 = pnand %p1356_p13, %p1355_p12 }
  0x1a   : > { %p1358_p3 = pneg %p1357_p0 }
  0x1c   : > { %p1363_p7 = pnand %p1361_p5, %p1358_p3 }
  0x1e   : > { %1366 = shalt.err (!%p1363_p7)
}
  0x1f   : > { %s1367_s11 = scalar_lea.vmem %s1627_s25, 2048  ;;  %p1375_p2 = scmp.lt.s32.totalorder %s1627_s25, %s1627_s25 }
  0x20   : > { %p1368_p9 = scmp.ne.s32.totalorder %s1627_s25, %s1367_s11  ;;  %p1376_p6 = scmp.lt.s32.totalorder %s1367_s11, %s1367_s11 }
  0x22   : > { %p1370_p10 = pnand %p1368_p9, %p1356_p13  ;;  %p1377_p4 = por %p1376_p6, %p1375_p2 }
  0x24   : > { %p1371_p1 = pneg %p1370_p10 }
  0x26   : > { %p1378_p8 = pnand %p1377_p4, %p1371_p1 }
  0x28   : > { %1381 = shalt.err (!%p1378_p8)
}
  0x29   : > { %s1545_s12 = smov 128   ;;  %s1546_s13 = smov 8  }
  0x2a   : > { %1255 = dma.hbm_to_vmem [thread:$0]  (!%p1634_p11), %s2164_s1, 2048, %s1627_s25, [#allocation6], %s1545_s12, %s1545_s12, %s1546_s13  }
  0x2b   : > { %p30_p2 = scmp.eq.s32.totalorder %s29_s29, 0  ;;  %p39_p1 = scmp.ne.s32.totalorder %s1538_s17, %s1534_s16 }
  0x2c   : > { %p40_p4 = scmp.eq.s32.totalorder %s1542_s18, 0  ;;  %p1271_p6 = scmp.lt.s32.totalorder %s1542_s18, 2 }
  0x2d   : > { %s1670_s30 = scalar_select %p30_p2, %s1538_s17, %s32_s28  }
  0x2e   : > { %p41_p8 = por %p40_p4, %p39_p1  ;;  %p2175_p10 = scmp.eq.s32.totalorder %s1602_s19, 1 }
  0x2f   : > { %s181_s6 = sand.u32 1, %s1538_s17   ;;  %s1220_s7 = sshll.u32 %s1542_s18, 11 }
  0x30   : > { %p1674_p12 = por %p2175_p10, %p39_p1  ;;  %s1168_s8 = sshll.u32 %s181_s6, 7 }
  0x31   : > { %s1683_s10 = scalar_lea.hbm %s2163_s0, %s1220_s7  ;;  %s185_s25 = scalar_lea.vmem [#allocation2], %s1168_s8 }
  0x32   : > { %s192_s28 = sshll.u32 %s185_s25, 4  ;;  %p1685_p11 = pnand %p1271_p6, %p41_p8  ;;  %s1689_s28 = int_to_ptr.vmem [resolvable:$true] %s192_s28 }
  0x33   : > { %s1691_s11 = scalar_lea.sflag [#allocation3], %s181_s6  ;;  %s1382_s12 = scalar_lea.hbm %s1683_s10, 2048 }
  0x34   : > { %p1383_p13 = scmp.ne.s32.totalorder %s1683_s10, %s1382_s12  ;;  %p1384_p0 = pneg %p1685_p11 }
  0x35   : > { %s1387_s24 = scalar_lea.hbm %s2163_s0, 4096  ;;  %p1388_p7 = scmp.lt.u32.totalorder %s1683_s10, %s2163_s0 }
  0x36   : > { %p1385_p3 = pnand %p1384_p0, %p1383_p13  ;;  %p1389_p9 = scmp.lt.u32.totalorder %s1387_s24, %s1382_s12 }
  0x37   : > { %p1391_p1 = scmp.lt.u32.totalorder %s1382_s12, %s1683_s10 }
  0x38   : > { %p1386_p5 = pneg %p1385_p3  ;;  %p1390_p2 = por %p1389_p9, %p1388_p7 }
  0x3a   : > { %p1392_p4 = por %p1391_p1, %p1390_p2 }
  0x3c   : > { %p1393_p6 = pnand %p1392_p4, %p1386_p5 }
  0x3e   : > { %1396 = shalt.err (!%p1393_p6)
}
  0x3f   : > { %s1397_s6 = scalar_lea.vmem %s1689_s28, 2048  ;;  %s1547_s26 = smov [#allocation2]  }
  0x40   : > { %p1398_p8 = scmp.ne.s32.totalorder %s1689_s28, %s1397_s6  ;;  %s1402_s9 = sshll.u32 %s1547_s26, 4  ;;  %s1403_s9 = int_to_ptr.vmem [resolvable:$false] %s1402_s9 }
  0x41   : > { %s1404_s25 = scalar_lea.vmem %s1403_s9, 4096  ;;  %p1405_p3 = scmp.lt.s32.totalorder %s1689_s28, %s1403_s9 }
  0x42   : > { %p1400_p10 = pnand %p1398_p8, %p1384_p0  ;;  %p1406_p7 = scmp.lt.s32.totalorder %s1404_s25, %s1397_s6 }
  0x44   : > { %p1401_p13 = pneg %p1400_p10  ;;  %p1407_p9 = por %p1406_p7, %p1405_p3 }
  0x46   : > { %p1408_p2 = pnand %p1407_p9, %p1401_p13 }
  0x48   : > { %1411 = shalt.err (!%p1408_p2)
}
  0x49   : > { %s1548_s12 = smov 64   ;;  %s1549_s13 = smov 4  }
  0x4a   : > { %1259 = dma.hbm_to_vmem [thread:$0]  (!%p1685_p11), %s1683_s10, 2048, %s1689_s28, %s1691_s11, %s1548_s12, %s1548_s12, %s1549_s13  }
  0x4b   : > { %p2178_p0 = scmp.ne.s32.totalorder %s2173_s23, 0 }
  0x4c   : > { %s1722_s14 = sand.u32 (!%p2178_p0), 1, %s1534_s16   ;;  %p2179_p5 = scmp.ne.s32.totalorder (!%p2178_p0), %s2171_s21, 0 }
  0x4d   : > { %204 = sbr.rel (%p2178_p0) target bundleno = 498 (0x1f2), region = 28  ;;  %s1172_s24 = sshll.u32 (!%p2178_p0), %s1722_s14, 7 }
  0x4e   : > { %s207_s7 = scalar_lea.sflag (!%p2178_p0), [#allocation3], %s1722_s14  ;;  %s1726_s8 = scalar_lea.vmem (!%p2178_p0), [#allocation2], %s1172_s24 }
  0x54   : > { %1513 = dma.done.wait (%p2179_p5), %s207_s7, 2048  }
  0x55   : > { %1515 = vsyncadd (%p2179_p5), %s207_s7, 4294965248  ;;  %p2180_p11 = scmp.eq.s32.totalorder %s1602_s19, 0 }
  0x57   : > { %1517 = dma.done.wait (%p2180_p11), [#allocation6], 2048   ;;  %p2181_p1 = pmov %p2180_p11 }
  0x58   : > { %v1550_v0 = vmov 0   ;;  %v1314_v1 = vld [vmem:[#allocation5 + $0x4] ss:$8 sps:$4 sm:$0xff]   ;;  %v1316_v2 = vld [vmem:[#allocation5] ss:$8 sps:$4 sm:$0xff]   ;;  %v1340_v21 = vld [vmem:[%s1726_s8 + $0x10] sm:$0xff]  }
  0x59   : > { %1519 = vsyncadd (%p2181_p1), [#allocation6], 4294965248  ;;  %509 = vmatprep.mubr.bf16.mxu0 %v1550_v0  ;;  %589 = vmatprep.mubr.bf16.mxu1 %v1550_v0  ;;  %v1317_v3 = vld [vmem:[#allocation5 + $0x14] ss:$8 sps:$4 sm:$0xff]   ;;  %v1319_v4 = vld [vmem:[#allocation5 + $0x10] ss:$8 sps:$4 sm:$0xff]  }
  0x5a   : > { %477 = vmatprep.subr.bf16.mxu0 %v1314_v1  ;;  %1224 = vmatprep.subr.bf16.mxu1 %v1314_v1  ;;  %v1320_v5 = vld [vmem:[#allocation5 + $0x24] ss:$8 sps:$4 sm:$0xff]   ;;  %v1322_v6 = vld [vmem:[#allocation5 + $0x20] ss:$8 sps:$4 sm:$0xff]   ;;  %v1323_v7 = vld [vmem:[#allocation5 + $0x34] ss:$8 sps:$4 sm:$0xff]  }
  0x5b   : > { %478 = vmatpush1.bf16.msra.mxu0 %v1316_v2  ;;  %1232 = vmatpush1.bf16.msra.mxu1 %v1316_v2  ;;  %v1325_v8 = vld [vmem:[#allocation5 + $0x30] ss:$8 sps:$4 sm:$0xff]   ;;  %v1326_v9 = vld [vmem:[#allocation5 + $0x44] ss:$8 sps:$4 sm:$0xff]   ;;  %v1328_v10 = vld [vmem:[#allocation5 + $0x40] ss:$8 sps:$4 sm:$0xff]  }
  0x5c   : > { %479 = vmatprep.subr.bf16.mxu0 %v1317_v3  ;;  %1225 = vmatprep.subr.bf16.mxu1 %v1317_v3  ;;  %v1329_v11 = vld [vmem:[#allocation5 + $0x54] ss:$8 sps:$4 sm:$0xff]   ;;  %v1331_v12 = vld [vmem:[#allocation5 + $0x50] ss:$8 sps:$4 sm:$0xff]   ;;  %v1332_v13 = vld [vmem:[#allocation5 + $0x64] ss:$8 sps:$4 sm:$0xff]  }
  0x5d   : > { %v1334_v14 = vld [vmem:[#allocation5 + $0x60] ss:$8 sps:$4 sm:$0xff]   ;;  %v1335_v15 = vld [vmem:[#allocation5 + $0x74] ss:$8 sps:$4 sm:$0xff]   ;;  %v1337_v16 = vld [vmem:[#allocation5 + $0x70] ss:$8 sps:$4 sm:$0xff]  }
  0x5e   : > { %v1338_v17 = vld [vmem:[%s1726_s8] sm:$0xff]   ;;  %v1339_v19 = vld [vmem:[%s1726_s8 + $0x8] sm:$0xff]   ;;  %v1346_v22 = vld [vmem:[%s1726_s8 + $0x50] sm:$0xff]   ;;  %s1174_s21 = sshll.u32 %s1722_s14, 8  ;;  %s971_s28 = sand.u32 1, %s1602_s19  }
  0x5f   : > { %480 = vmatpush1.bf16.msra.mxu0 %v1319_v4  ;;  %1233 = vmatpush1.bf16.msra.mxu1 %v1319_v4  ;;  %v1342_v18 = vld [vmem:[%s1726_s8 + $0x40] sm:$0xff]   ;;  %v1344_v20 = vld [vmem:[%s1726_s8 + $0x48] sm:$0xff]   ;;  %v1341_v23 = vld [vmem:[%s1726_s8 + $0x18] sm:$0xff]   ;;  %s1771_s23 = scalar_lea.vmem [#allocation7], %s1174_s21  ;;  %s1778_s10 = scalar_lea.vmem [#allocation8], %s1174_s21 }
  0x60   : > { %481 = vmatprep.subr.bf16.mxu0 %v1320_v5  ;;  %1226 = vmatprep.subr.bf16.mxu1 %v1320_v5  ;;  %v1348_v24 = vld [vmem:[%s1726_s8 + $0x58] sm:$0xff]   ;;  %v1343_v25 = vld [vmem:[%s1726_s8 + $0x20] sm:$0xff]   ;;  %v1345_v27 = vld [vmem:[%s1726_s8 + $0x28] sm:$0xff]   ;;  %s1221_s29 = sshll.u32 %s1602_s19, 12  ;;  %s990_s11 = sshll.u32 %s1771_s23, 4  ;;  %s1929_s11 = int_to_ptr.vmem [resolvable:$true] %s990_s11 }
  0x61   : > { %v1350_v26 = vld [vmem:[%s1726_s8 + $0x60] sm:$0xff]   ;;  %v1351_v28 = vld [vmem:[%s1726_s8 + $0x68] sm:$0xff]   ;;  %v1347_v29 = vld [vmem:[%s1726_s8 + $0x30] sm:$0xff]   ;;  %s1006_s6 = sshll.u32 %s1778_s10, 4  ;;  %s1927_s25 = scalar_lea.hbm %s2165_s2, %s1221_s29  ;;  %s1941_s6 = int_to_ptr.vmem [resolvable:$true] %s1006_s6 }
  0x62   : > { %v1352_v30 = vld [vmem:[%s1726_s8 + $0x70] sm:$0xff]   ;;  %v1349_v31 = vld [vmem:[%s1726_s8 + $0x38] sm:$0xff]   ;;  %s1939_s24 = scalar_lea.hbm %s2166_s3, %s1221_s29  ;;  %s967_s7 = scalar_lea.sflag [#allocation4], %s1722_s14 }
  0x63   : > { %482 = vmatpush1.bf16.msra.mxu0 %v1322_v6  ;;  %1234 = vmatpush1.bf16.msra.mxu1 %v1322_v6  ;;  %v1353_v32 = vld [vmem:[%s1726_s8 + $0x78] sm:$0xff]   ;;  %s1412_s8 = scalar_lea.vmem %s1929_s11, 4096  ;;  %s1551_s21 = smov [#allocation7]  }
  0x64   : > { %483 = vmatprep.subr.bf16.mxu0 %v1323_v7  ;;  %1227 = vmatprep.subr.bf16.mxu1 %v1323_v7  ;;  %p1413_p4 = scmp.ne.s32.totalorder %s1929_s11, %s1412_s8 }
  0x66   : > { %p1414_p6 = pnand %p1413_p4, %p1674_p12 }
  0x67   : > { %484 = vmatpush1.bf16.msra.mxu0 %v1325_v8  ;;  %1235 = vmatpush1.bf16.msra.mxu1 %v1325_v8 }
  0x68   : > { %485 = vmatprep.subr.bf16.mxu0 %v1326_v9  ;;  %1228 = vmatprep.subr.bf16.mxu1 %v1326_v9  ;;  %p1415_p8 = pneg %p1414_p6 }
  0x6b   : > { %486 = vmatpush1.bf16.msra.mxu0 %v1328_v10  ;;  %1236 = vmatpush1.bf16.msra.mxu1 %v1328_v10 }
  0x6c   : > { %487 = vmatprep.subr.bf16.mxu0 %v1329_v11  ;;  %1229 = vmatprep.subr.bf16.mxu1 %v1329_v11 }
  0x6f   : > { %488 = vmatpush1.bf16.msra.mxu0 %v1331_v12  ;;  %1237 = vmatpush1.bf16.msra.mxu1 %v1331_v12 }
  0x70   : > { %489 = vmatprep.subr.bf16.mxu0 %v1332_v13  ;;  %1230 = vmatprep.subr.bf16.mxu1 %v1332_v13 }
  0x73   : > { %490 = vmatpush1.bf16.msra.mxu0 %v1334_v14  ;;  %1238 = vmatpush1.bf16.msra.mxu1 %v1334_v14 }
  0x74   : > { %491 = vmatprep.subr.bf16.mxu0 %v1335_v15  ;;  %1231 = vmatprep.subr.bf16.mxu1 %v1335_v15 }
  0x77   : > { %492 = vmatpush1.bf16.msra.mxu0 %v1337_v16  ;;  %1239 = vmatpush1.bf16.msra.mxu1 %v1337_v16 }
  0x7a   : > { %510 = vmatmul.mubr.bf16.vlgmr.msra.gmra.mrb[0].mxu0 %v1338_v17  ;;  %590 = vmatmul.mubr.bf16.vlgmr.msra.gmra.mrb[0].mxu1 %v1342_v18 }
  0x7b   : > { %519 = vmatprep.mubr.bf16.mxu0 %v1550_v0  ;;  %599 = vmatprep.mubr.bf16.mxu1 %v1550_v0 }
  0x82   : > { %520 = vmatmul.mubr.bf16.gmra.mrb[4].mxu0 %v1339_v19  ;;  %600 = vmatmul.mubr.bf16.gmra.mrb[4].mxu1 %v1344_v20 }
  0x83   : > { %529 = vmatprep.mubr.bf16.mxu0 %v1550_v0  ;;  %609 = vmatprep.mubr.bf16.mxu1 %v1550_v0 }
  0x8a   : > { %530 = vmatmul.mubr.bf16.gmra.mrb[8].mxu0 %v1340_v21  ;;  %610 = vmatmul.mubr.bf16.gmra.mrb[8].mxu1 %v1346_v22 }
  0x8b   : > { %539 = vmatprep.mubr.bf16.mxu0 %v1550_v0  ;;  %619 = vmatprep.mubr.bf16.mxu1 %v1550_v0 }
  0x92   : > { %540 = vmatmul.mubr.bf16.gmra.mrb[12].mxu0 %v1341_v23  ;;  %620 = vmatmul.mubr.bf16.gmra.mrb[12].mxu1 %v1348_v24 }
  0x93   : > { %549 = vmatprep.mubr.bf16.mxu0 %v1550_v0  ;;  %629 = vmatprep.mubr.bf16.mxu1 %v1550_v0 }
  0x9a   : > { %550 = vmatmul.mubr.bf16.gmra.mrb[16].mxu0 %v1343_v25  ;;  %630 = vmatmul.mubr.bf16.gmra.mrb[16].mxu1 %v1350_v26 }
  0x9b   : > { %559 = vmatprep.mubr.bf16.mxu0 %v1550_v0  ;;  %639 = vmatprep.mubr.bf16.mxu1 %v1550_v0 }
  0xa2   : > { %560 = vmatmul.mubr.bf16.gmra.mrb[20].mxu0 %v1345_v27  ;;  %640 = vmatmul.mubr.bf16.gmra.mrb[20].mxu1 %v1351_v28 }
  0xa3   : > { %569 = vmatprep.mubr.bf16.mxu0 %v1550_v0  ;;  %649 = vmatprep.mubr.bf16.mxu1 %v1550_v0 }
  0xaa   : > { %570 = vmatmul.mubr.bf16.gmra.mrb[24].mxu0 %v1347_v29  ;;  %650 = vmatmul.mubr.bf16.gmra.mrb[24].mxu1 %v1352_v30 }
  0xab   : > { %579 = vmatprep.mubr.bf16.mxu0 %v1550_v0  ;;  %659 = vmatprep.mubr.bf16.mxu1 %v1550_v0 }
  0xb2   : > { %580 = vmatmul.mubr.bf16.gmra.mrb[28].mxu0 %v1349_v31  ;;  %660 = vmatmul.mubr.bf16.gmra.mrb[28].mxu1 %v1353_v32 }
 0x14d   : > { %v511_v33 = vpop.f32.mrb[0].mxu0  ;;  %v1769_v34 = vpop.f32.mrb[0].mxu1 }
 0x14e   : > { %670 = vst [vmem:[%s1771_s23] sm:$0xff] %v511_v33  ;;  %v513_v35 = vpop.f32.mrb[1].mxu0  ;;  %686 = vst [vmem:[%s1771_s23 + $0x80] sm:$0xff] %v1769_v34  ;;  %v1776_v36 = vpop.f32.mrb[1].mxu1  ;;  %v808_v39 = vmul.f32 %v511_v33, %v511_v33 }
 0x14f   : > { %702 = vst [vmem:[%s1778_s10] sm:$0xff] %v513_v35  ;;  %v515_v37 = vpop.f32.mrb[2].mxu0  ;;  %718 = vst [vmem:[%s1778_s10 + $0x80] sm:$0xff] %v1776_v36  ;;  %v1783_v38 = vpop.f32.mrb[2].mxu1  ;;  %v809_v44 = vmul.f32 %v513_v35, %v513_v35 }
 0x150   : > { %671 = vst [vmem:[%s1771_s23 + $0x8] sm:$0xff] %v515_v37  ;;  %v734_v40 = vadd.f32 %v515_v37, %v511_v33  ;;  %v810_v41 = vmul.f32 %v515_v37, %v515_v37  ;;  %v517_v42 = vpop.f32.mrb[3].mxu0  ;;  %687 = vst [vmem:[%s1771_s23 + $0x88] sm:$0xff] %v1783_v38  ;;  %v1788_v43 = vpop.f32.mrb[3].mxu1 }
 0x151   : > { %703 = vst [vmem:[%s1778_s10 + $0x8] sm:$0xff] %v517_v42  ;;  %v771_v45 = vadd.f32 %v517_v42, %v513_v35  ;;  %v811_v46 = vmul.f32 %v517_v42, %v517_v42  ;;  %719 = vst [vmem:[%s1778_s10 + $0x88] sm:$0xff] %v1788_v43 }
 0x152   : > { %v872_v47 = vadd.f32 %v810_v41, %v808_v39 }
 0x153   : > { %v909_v48 = vadd.f32 %v811_v46, %v809_v44 }
 0x155   : > { %v521_v49 = vpop.f32.mrb[4].mxu0  ;;  %v1793_v50 = vpop.f32.mrb[4].mxu1 }
 0x156   : > { %672 = vst [vmem:[%s1771_s23 + $0x10] sm:$0xff] %v521_v49  ;;  %v735_v51 = vadd.f32 %v734_v40, %v521_v49  ;;  %v812_v52 = vmul.f32 %v521_v49, %v521_v49  ;;  %v523_v53 = vpop.f32.mrb[5].mxu0  ;;  %688 = vst [vmem:[%s1771_s23 + $0x90] sm:$0xff] %v1793_v50  ;;  %v1798_v54 = vpop.f32.mrb[5].mxu1 }
 0x157   : > { %704 = vst [vmem:[%s1778_s10 + $0x10] sm:$0xff] %v523_v53  ;;  %v772_v55 = vadd.f32 %v771_v45, %v523_v53  ;;  %v813_v56 = vmul.f32 %v523_v53, %v523_v53  ;;  %v525_v57 = vpop.f32.mrb[6].mxu0  ;;  %720 = vst [vmem:[%s1778_s10 + $0x90] sm:$0xff] %v1798_v54  ;;  %v1803_v58 = vpop.f32.mrb[6].mxu1 }
 0x158   : > { %v873_v59 = vadd.f32 %v872_v47, %v812_v52  ;;  %673 = vst [vmem:[%s1771_s23 + $0x18] sm:$0xff] %v525_v57  ;;  %v736_v60 = vadd.f32 %v735_v51, %v525_v57  ;;  %v814_v61 = vmul.f32 %v525_v57, %v525_v57  ;;  %v527_v62 = vpop.f32.mrb[7].mxu0  ;;  %689 = vst [vmem:[%s1771_s23 + $0x98] sm:$0xff] %v1803_v58  ;;  %v1808_v63 = vpop.f32.mrb[7].mxu1 }
 0x159   : > { %v910_v0 = vadd.f32 %v909_v48, %v813_v56  ;;  %705 = vst [vmem:[%s1778_s10 + $0x18] sm:$0xff] %v527_v62  ;;  %v773_v1 = vadd.f32 %v772_v55, %v527_v62  ;;  %v815_v2 = vmul.f32 %v527_v62, %v527_v62  ;;  %721 = vst [vmem:[%s1778_s10 + $0x98] sm:$0xff] %v1808_v63 }
 0x15a   : > { %v874_v3 = vadd.f32 %v873_v59, %v814_v61 }
 0x15b   : > { %v911_v4 = vadd.f32 %v910_v0, %v815_v2 }
 0x15d   : > { %v531_v5 = vpop.f32.mrb[8].mxu0  ;;  %v1813_v6 = vpop.f32.mrb[8].mxu1 }
 0x15e   : > { %674 = vst [vmem:[%s1771_s23 + $0x20] sm:$0xff] %v531_v5  ;;  %v737_v7 = vadd.f32 %v736_v60, %v531_v5  ;;  %v816_v8 = vmul.f32 %v531_v5, %v531_v5  ;;  %v533_v9 = vpop.f32.mrb[9].mxu0  ;;  %690 = vst [vmem:[%s1771_s23 + $0xa0] sm:$0xff] %v1813_v6  ;;  %v1818_v10 = vpop.f32.mrb[9].mxu1 }
 0x15f   : > { %706 = vst [vmem:[%s1778_s10 + $0x20] sm:$0xff] %v533_v9  ;;  %v774_v11 = vadd.f32 %v773_v1, %v533_v9  ;;  %v817_v12 = vmul.f32 %v533_v9, %v533_v9  ;;  %v535_v13 = vpop.f32.mrb[10].mxu0  ;;  %722 = vst [vmem:[%s1778_s10 + $0xa0] sm:$0xff] %v1818_v10  ;;  %v1823_v14 = vpop.f32.mrb[10].mxu1 }
 0x160   : > { %v875_v15 = vadd.f32 %v874_v3, %v816_v8  ;;  %675 = vst [vmem:[%s1771_s23 + $0x28] sm:$0xff] %v535_v13  ;;  %v738_v16 = vadd.f32 %v737_v7, %v535_v13  ;;  %v818_v17 = vmul.f32 %v535_v13, %v535_v13  ;;  %v537_v18 = vpop.f32.mrb[11].mxu0  ;;  %691 = vst [vmem:[%s1771_s23 + $0xa8] sm:$0xff] %v1823_v14  ;;  %v1828_v19 = vpop.f32.mrb[11].mxu1 }
 0x161   : > { %v912_v20 = vadd.f32 %v911_v4, %v817_v12  ;;  %707 = vst [vmem:[%s1778_s10 + $0x28] sm:$0xff] %v537_v18  ;;  %v775_v21 = vadd.f32 %v774_v11, %v537_v18  ;;  %v819_v22 = vmul.f32 %v537_v18, %v537_v18  ;;  %723 = vst [vmem:[%s1778_s10 + $0xa8] sm:$0xff] %v1828_v19 }
 0x162   : > { %v876_v23 = vadd.f32 %v875_v15, %v818_v17 }
 0x163   : > { %v913_v24 = vadd.f32 %v912_v20, %v819_v22 }
 0x165   : > { %v541_v25 = vpop.f32.mrb[12].mxu0  ;;  %v1833_v26 = vpop.f32.mrb[12].mxu1 }
 0x166   : > { %676 = vst [vmem:[%s1771_s23 + $0x30] sm:$0xff] %v541_v25  ;;  %v739_v27 = vadd.f32 %v738_v16, %v541_v25  ;;  %v820_v28 = vmul.f32 %v541_v25, %v541_v25  ;;  %v543_v29 = vpop.f32.mrb[13].mxu0  ;;  %692 = vst [vmem:[%s1771_s23 + $0xb0] sm:$0xff] %v1833_v26  ;;  %v1838_v30 = vpop.f32.mrb[13].mxu1 }
 0x167   : > { %708 = vst [vmem:[%s1778_s10 + $0x30] sm:$0xff] %v543_v29  ;;  %v776_v31 = vadd.f32 %v775_v21, %v543_v29  ;;  %v821_v32 = vmul.f32 %v543_v29, %v543_v29  ;;  %v545_v33 = vpop.f32.mrb[14].mxu0  ;;  %724 = vst [vmem:[%s1778_s10 + $0xb0] sm:$0xff] %v1838_v30  ;;  %v1843_v35 = vpop.f32.mrb[14].mxu1 }
 0x168   : > { %v877_v37 = vadd.f32 %v876_v23, %v820_v28  ;;  %677 = vst [vmem:[%s1771_s23 + $0x38] sm:$0xff] %v545_v33  ;;  %v740_v39 = vadd.f32 %v739_v27, %v545_v33  ;;  %v822_v40 = vmul.f32 %v545_v33, %v545_v33  ;;  %v547_v41 = vpop.f32.mrb[15].mxu0  ;;  %693 = vst [vmem:[%s1771_s23 + $0xb8] sm:$0xff] %v1843_v35  ;;  %v1848_v42 = vpop.f32.mrb[15].mxu1 }
 0x169   : > { %v914_v44 = vadd.f32 %v913_v24, %v821_v32  ;;  %709 = vst [vmem:[%s1778_s10 + $0x38] sm:$0xff] %v547_v41  ;;  %v777_v45 = vadd.f32 %v776_v31, %v547_v41  ;;  %v823_v46 = vmul.f32 %v547_v41, %v547_v41  ;;  %725 = vst [vmem:[%s1778_s10 + $0xb8] sm:$0xff] %v1848_v42 }
 0x16a   : > { %v878_v47 = vadd.f32 %v877_v37, %v822_v40 }
 0x16b   : > { %v915_v48 = vadd.f32 %v914_v44, %v823_v46 }
 0x16d   : > { %v551_v49 = vpop.f32.mrb[16].mxu0  ;;  %v1853_v51 = vpop.f32.mrb[16].mxu1 }
 0x16e   : > { %678 = vst [vmem:[%s1771_s23 + $0x40] sm:$0xff] %v551_v49  ;;  %v741_v52 = vadd.f32 %v740_v39, %v551_v49  ;;  %v824_v53 = vmul.f32 %v551_v49, %v551_v49  ;;  %v553_v55 = vpop.f32.mrb[17].mxu0  ;;  %694 = vst [vmem:[%s1771_s23 + $0xc0] sm:$0xff] %v1853_v51  ;;  %v1858_v56 = vpop.f32.mrb[17].mxu1 }
 0x16f   : > { %710 = vst [vmem:[%s1778_s10 + $0x40] sm:$0xff] %v553_v55  ;;  %v778_v57 = vadd.f32 %v777_v45, %v553_v55  ;;  %v825_v59 = vmul.f32 %v553_v55, %v553_v55  ;;  %v555_v60 = vpop.f32.mrb[18].mxu0  ;;  %726 = vst [vmem:[%s1778_s10 + $0xc0] sm:$0xff] %v1858_v56  ;;  %v1863_v61 = vpop.f32.mrb[18].mxu1 }
 0x170   : > { %v879_v62 = vadd.f32 %v878_v47, %v824_v53  ;;  %679 = vst [vmem:[%s1771_s23 + $0x48] sm:$0xff] %v555_v60  ;;  %v742_v0 = vadd.f32 %v741_v52, %v555_v60  ;;  %v826_v1 = vmul.f32 %v555_v60, %v555_v60  ;;  %v557_v2 = vpop.f32.mrb[19].mxu0  ;;  %695 = vst [vmem:[%s1771_s23 + $0xc8] sm:$0xff] %v1863_v61  ;;  %v1868_v3 = vpop.f32.mrb[19].mxu1 }
 0x171   : > { %v916_v4 = vadd.f32 %v915_v48, %v825_v59  ;;  %711 = vst [vmem:[%s1778_s10 + $0x48] sm:$0xff] %v557_v2  ;;  %v779_v5 = vadd.f32 %v778_v57, %v557_v2  ;;  %v827_v7 = vmul.f32 %v557_v2, %v557_v2  ;;  %727 = vst [vmem:[%s1778_s10 + $0xc8] sm:$0xff] %v1868_v3 }
 0x172   : > { %v880_v8 = vadd.f32 %v879_v62, %v826_v1 }
 0x173   : > { %v917_v9 = vadd.f32 %v916_v4, %v827_v7 }
 0x175   : > { %v561_v11 = vpop.f32.mrb[20].mxu0  ;;  %v1873_v12 = vpop.f32.mrb[20].mxu1 }
 0x176   : > { %680 = vst [vmem:[%s1771_s23 + $0x50] sm:$0xff] %v561_v11  ;;  %v743_v13 = vadd.f32 %v742_v0, %v561_v11  ;;  %v828_v15 = vmul.f32 %v561_v11, %v561_v11  ;;  %v563_v16 = vpop.f32.mrb[21].mxu0  ;;  %696 = vst [vmem:[%s1771_s23 + $0xd0] sm:$0xff] %v1873_v12  ;;  %v1878_v17 = vpop.f32.mrb[21].mxu1 }
 0x177   : > { %712 = vst [vmem:[%s1778_s10 + $0x50] sm:$0xff] %v563_v16  ;;  %v780_v18 = vadd.f32 %v779_v5, %v563_v16  ;;  %v829_v20 = vmul.f32 %v563_v16, %v563_v16  ;;  %v565_v21 = vpop.f32.mrb[22].mxu0  ;;  %728 = vst [vmem:[%s1778_s10 + $0xd0] sm:$0xff] %v1878_v17  ;;  %v1883_v22 = vpop.f32.mrb[22].mxu1 }
 0x178   : > { %v881_v23 = vadd.f32 %v880_v8, %v828_v15  ;;  %681 = vst [vmem:[%s1771_s23 + $0x58] sm:$0xff] %v565_v21  ;;  %v744_v24 = vadd.f32 %v743_v13, %v565_v21  ;;  %v830_v25 = vmul.f32 %v565_v21, %v565_v21  ;;  %v567_v27 = vpop.f32.mrb[23].mxu0  ;;  %697 = vst [vmem:[%s1771_s23 + $0xd8] sm:$0xff] %v1883_v22  ;;  %v1888_v28 = vpop.f32.mrb[23].mxu1 }
 0x179   : > { %v918_v29 = vadd.f32 %v917_v9, %v829_v20  ;;  %713 = vst [vmem:[%s1778_s10 + $0x58] sm:$0xff] %v567_v27  ;;  %v781_v31 = vadd.f32 %v780_v18, %v567_v27  ;;  %v831_v32 = vmul.f32 %v567_v27, %v567_v27  ;;  %729 = vst [vmem:[%s1778_s10 + $0xd8] sm:$0xff] %v1888_v28 }
 0x17a   : > { %v882_v33 = vadd.f32 %v881_v23, %v830_v25 }
 0x17b   : > { %v919_v37 = vadd.f32 %v918_v29, %v831_v32 }
 0x17d   : > { %v571_v39 = vpop.f32.mrb[24].mxu0  ;;  %v1893_v40 = vpop.f32.mrb[24].mxu1 }
 0x17e   : > { %682 = vst [vmem:[%s1771_s23 + $0x60] sm:$0xff] %v571_v39  ;;  %v745_v41 = vadd.f32 %v744_v24, %v571_v39  ;;  %v832_v44 = vmul.f32 %v571_v39, %v571_v39  ;;  %v573_v45 = vpop.f32.mrb[25].mxu0  ;;  %698 = vst [vmem:[%s1771_s23 + $0xe0] sm:$0xff] %v1893_v40  ;;  %v1898_v46 = vpop.f32.mrb[25].mxu1 }
 0x17f   : > { %714 = vst [vmem:[%s1778_s10 + $0x60] sm:$0xff] %v573_v45  ;;  %v782_v47 = vadd.f32 %v781_v31, %v573_v45  ;;  %v833_v48 = vmul.f32 %v573_v45, %v573_v45  ;;  %v575_v49 = vpop.f32.mrb[26].mxu0  ;;  %730 = vst [vmem:[%s1778_s10 + $0xe0] sm:$0xff] %v1898_v46  ;;  %v1903_v52 = vpop.f32.mrb[26].mxu1 }
 0x180   : > { %v883_v53 = vadd.f32 %v882_v33, %v832_v44  ;;  %683 = vst [vmem:[%s1771_s23 + $0x68] sm:$0xff] %v575_v49  ;;  %v746_v55 = vadd.f32 %v745_v41, %v575_v49  ;;  %v834_v57 = vmul.f32 %v575_v49, %v575_v49  ;;  %v577_v59 = vpop.f32.mrb[27].mxu0  ;;  %699 = vst [vmem:[%s1771_s23 + $0xe8] sm:$0xff] %v1903_v52  ;;  %v1908_v60 = vpop.f32.mrb[27].mxu1 }
 0x181   : > { %v920_v62 = vadd.f32 %v919_v37, %v833_v48  ;;  %715 = vst [vmem:[%s1778_s10 + $0x68] sm:$0xff] %v577_v59  ;;  %v783_v0 = vadd.f32 %v782_v47, %v577_v59  ;;  %v835_v1 = vmul.f32 %v577_v59, %v577_v59  ;;  %731 = vst [vmem:[%s1778_s10 + $0xe8] sm:$0xff] %v1908_v60 }
 0x182   : > { %v884_v2 = vadd.f32 %v883_v53, %v834_v57 }
 0x183   : > { %v921_v4 = vadd.f32 %v920_v62, %v835_v1 }
 0x185   : > { %v581_v5 = vpop.f32.mrb[28].mxu0  ;;  %v1917_v7 = vpop.f32.mrb[28].mxu1 }
 0x186   : > { %684 = vst [vmem:[%s1771_s23 + $0x70] sm:$0xff] %v581_v5  ;;  %v747_v8 = vadd.f32 %v746_v55, %v581_v5  ;;  %v836_v9 = vmul.f32 %v581_v5, %v581_v5  ;;  %v583_v11 = vpop.f32.mrb[29].mxu0  ;;  %700 = vst [vmem:[%s1771_s23 + $0xf0] sm:$0xff] %v1917_v7  ;;  %v1922_v13 = vpop.f32.mrb[29].mxu1 }
 0x187   : > { %716 = vst [vmem:[%s1778_s10 + $0x70] sm:$0xff] %v583_v11  ;;  %v784_v15 = vadd.f32 %v783_v0, %v583_v11  ;;  %v837_v16 = vmul.f32 %v583_v11, %v583_v11  ;;  %v585_v18 = vpop.f32.mrb[30].mxu0  ;;  %732 = vst [vmem:[%s1778_s10 + $0xf0] sm:$0xff] %v1922_v13  ;;  %v1934_v20 = vpop.f32.mrb[30].mxu1 }
 0x188   : > { %v885_v21 = vadd.f32 %v884_v2, %v836_v9  ;;  %685 = vst [vmem:[%s1771_s23 + $0x78] sm:$0xff] %v585_v18  ;;  %v748_v23 = vadd.f32 %v747_v8, %v585_v18  ;;  %v838_v24 = vmul.f32 %v585_v18, %v585_v18  ;;  %v587_v25 = vpop.f32.mrb[31].mxu0  ;;  %701 = vst [vmem:[%s1771_s23 + $0xf8] sm:$0xff] %v1934_v20  ;;  %v1946_v27 = vpop.f32.mrb[31].mxu1  ;;  %s1416_s23 = sshll.u32 %s1551_s21, 4  ;;  %s1417_s23 = int_to_ptr.vmem [resolvable:$false] %s1416_s23 }
 0x189   : > { %v1948_v29 = vadd.f32 %v921_v4, %v837_v16  ;;  %717 = vst [vmem:[%s1778_s10 + $0x78] sm:$0xff] %v587_v25  ;;  %v1951_v31 = vadd.f32 %v784_v15, %v587_v25  ;;  %v1953_v32 = vmul.f32 %v587_v25, %v587_v25  ;;  %733 = vst [vmem:[%s1778_s10 + $0xf8] sm:$0xff] %v1946_v27  ;;  %s1418_s29 = scalar_lea.vmem %s1417_s23, 8192  ;;  %p1419_p10 = scmp.lt.s32.totalorder %s1929_s11, %s1417_s23 }
 0x18a   : > { %p1420_p13 = scmp.lt.s32.totalorder %s1418_s29, %s1412_s8 }
 0x18c   : > { %p1421_p3 = por %p1420_p13, %p1419_p10 }
 0x18e   : > { %p1422_p7 = pnand %p1421_p3, %p1415_p8 }
 0x190   : > { %1425 = shalt.err (!%p1422_p7)
}
 0x191   : > { %s1426_s10 = scalar_lea.hbm %s1927_s25, 4096  ;;  %s1430_s12 = scalar_lea.hbm %s2165_s2, 8192 }
 0x192   : > { %p1427_p9 = scmp.ne.s32.totalorder %s1927_s25, %s1426_s10  ;;  %p1431_p5 = scmp.lt.u32.totalorder %s1927_s25, %s2165_s2 }
 0x193   : > { %p1432_p11 = scmp.lt.u32.totalorder %s1430_s12, %s1426_s10  ;;  %p1434_p4 = scmp.lt.u32.totalorder %s1426_s10, %s1927_s25 }
 0x194   : > { %p1428_p2 = pnand %p1427_p9, %p1674_p12 }
 0x195   : > { %p1433_p1 = por %p1432_p11, %p1431_p5 }
 0x196   : > { %p1429_p0 = pneg %p1428_p2 }
 0x197   : > { %p1435_p6 = por %p1434_p4, %p1433_p1 }
 0x199   : > { %p1436_p8 = pnand %p1435_p6, %p1429_p0 }
 0x19b   : > { %1439 = shalt.err (!%p1436_p8)
}
 0x19c   : > { %s1552_s8 = smov 128   ;;  %s1553_s23 = smov 8   ;;  %v840_v33 = vmul.f32 %v1769_v34, %v1769_v34  ;;  %v749_v37 = vadd.f32 %v748_v23, %v1769_v34  ;;  %v886_v39 = vadd.f32 %v885_v21, %v838_v24 }
 0x19d   : > { %1246 = dma.vmem_to_hbm [thread:$0]  (%p1674_p12), %s1929_s11, 4096, %s1927_s25, %s967_s7, %s1552_s8, %s1552_s8, %s1553_s23  }
 0x19e   : > { %s1989_s29 = scalar_lea.sflag [#allocation9], %s971_s28  ;;  %s1440_s10 = scalar_lea.vmem %s1941_s6, 4096 }
 0x19f   : > { %p1441_p10 = scmp.ne.s32.totalorder %s1941_s6, %s1440_s10  ;;  %s1554_s26 = smov [#allocation8]  }
 0x1a0   : > { %s1444_s9 = sshll.u32 %s1554_s26, 4  ;;  %s1445_s9 = int_to_ptr.vmem [resolvable:$false] %s1444_s9 }
 0x1a1   : > { %p1442_p13 = pnand %p1441_p10, %p1674_p12  ;;  %s1446_s12 = scalar_lea.vmem %s1445_s9, 8192 }
 0x1a2   : > { %p1447_p7 = scmp.lt.s32.totalorder %s1941_s6, %s1445_s9  ;;  %p1448_p9 = scmp.lt.s32.totalorder %s1446_s12, %s1440_s10 }
 0x1a3   : > { %p1443_p3 = pneg %p1442_p13 }
 0x1a4   : > { %p1449_p2 = por %p1448_p9, %p1447_p7 }
 0x1a6   : > { %p1450_p0 = pnand %p1449_p2, %p1443_p3 }
 0x1a8   : > { %1453 = shalt.err (!%p1450_p0)
}
 0x1a9   : > { %s1454_s28 = scalar_lea.hbm %s1939_s24, 4096  ;;  %s1458_s7 = scalar_lea.hbm %s2166_s3, 8192 }
 0x1aa   : > { %p1455_p5 = scmp.ne.s32.totalorder %s1939_s24, %s1454_s28  ;;  %p1459_p4 = scmp.lt.u32.totalorder %s1939_s24, %s2166_s3 }
 0x1ab   : > { %p1460_p6 = scmp.lt.u32.totalorder %s1458_s7, %s1454_s28  ;;  %p1462_p10 = scmp.lt.u32.totalorder %s1454_s28, %s1939_s24 }
 0x1ac   : > { %p1456_p11 = pnand %p1455_p5, %p1674_p12 }
 0x1ad   : > { %p1461_p8 = por %p1460_p6, %p1459_p4 }
 0x1ae   : > { %p1457_p1 = pneg %p1456_p11 }
 0x1af   : > { %p1463_p13 = por %p1462_p10, %p1461_p8 }
 0x1b1   : > { %p1464_p3 = pnand %p1463_p13, %p1457_p1 }
 0x1b3   : > { %1467 = shalt.err (!%p1464_p3)
}
 0x1b4   : > { %1247 = dma.vmem_to_hbm [thread:$0]  (%p1674_p12), %s1941_s6, 4096, %s1939_s24, %s1989_s29, %s1552_s8, %s1552_s8, %s1553_s23   ;;  %v841_v34 = vmul.f32 %v1776_v36, %v1776_v36  ;;  %v786_v41 = vadd.f32 %v1951_v31, %v1776_v36  ;;  %v923_v44 = vadd.f32 %v1948_v29, %v1953_v32  ;;  %v842_v45 = vmul.f32 %v1783_v38, %v1783_v38 }
 0x1b5   : > { %v750_v47 = vadd.f32 %v749_v37, %v1783_v38  ;;  %v887_v48 = vadd.f32 %v886_v39, %v840_v33  ;;  %v843_v49 = vmul.f32 %v1788_v43, %v1788_v43  ;;  %v844_v57 = vmul.f32 %v1793_v50, %v1793_v50  ;;  %s1176_s6 = sshll.u32 %s1722_s14, 5  ;;  %s1223_s24 = sshll.u32 %s1602_s19, 9 }
 0x1b6   : > { %v787_v53 = vadd.f32 %v786_v41, %v1788_v43  ;;  %v924_v55 = vadd.f32 %v923_v44, %v841_v34  ;;  %v845_v62 = vmul.f32 %v1798_v54, %v1798_v54  ;;  %v846_v38 = vmul.f32 %v1803_v58, %v1803_v58  ;;  %s248_s8 = scalar_lea.vmem [#allocation10], %s1176_s6  ;;  %s2117_s26 = scalar_lea.hbm %s2167_s4, %s1223_s24 }
 0x1b7   : > { %v751_v36 = vadd.f32 %v750_v47, %v1793_v50  ;;  %v888_v59 = vadd.f32 %v887_v48, %v842_v45  ;;  %v847_v43 = vmul.f32 %v1808_v63, %v1808_v63  ;;  %v848_v50 = vmul.f32 %v1813_v6, %v1813_v6  ;;  %s1023_s23 = sshll.u32 %s248_s8, 4  ;;  %s1555_s9 = smov [#allocation10]   ;;  %s2119_s23 = int_to_ptr.vmem [resolvable:$true] %s1023_s23 }
 0x1b8   : > { %v788_v0 = vadd.f32 %v787_v53, %v1798_v54  ;;  %v925_v1 = vadd.f32 %v924_v55, %v843_v49  ;;  %v849_v54 = vmul.f32 %v1818_v10, %v1818_v10  ;;  %v856_v41 = vmul.f32 %v1853_v51, %v1853_v51  ;;  %s1468_s19 = scalar_lea.vmem %s2119_s23, 512  ;;  %s1472_s12 = sshll.u32 %s1555_s9, 4  ;;  %s1473_s12 = int_to_ptr.vmem [resolvable:$false] %s1472_s12 }
 0x1b9   : > { %v752_v2 = vadd.f32 %v751_v36, %v1803_v58  ;;  %v889_v4 = vadd.f32 %v888_v59, %v844_v57  ;;  %v850_v58 = vmul.f32 %v1823_v14, %v1823_v14  ;;  %v857_v45 = vmul.f32 %v1858_v56, %v1858_v56  ;;  %p1469_p7 = scmp.ne.s32.totalorder %s2119_s23, %s1468_s19  ;;  %s1474_s28 = scalar_lea.vmem %s1473_s12, 1024 }
 0x1ba   : > { %v789_v5 = vadd.f32 %v788_v0, %v1808_v63  ;;  %v926_v8 = vadd.f32 %v925_v1, %v845_v62  ;;  %v851_v63 = vmul.f32 %v1828_v19, %v1828_v19  ;;  %v858_v49 = vmul.f32 %v1863_v61, %v1863_v61  ;;  %p1475_p0 = scmp.lt.s32.totalorder %s2119_s23, %s1473_s12  ;;  %p1476_p5 = scmp.lt.s32.totalorder %s1474_s28, %s1468_s19 }
 0x1bb   : > { %v890_v9 = vadd.f32 %v889_v4, %v846_v38  ;;  %v753_v11 = vadd.f32 %v752_v2, %v1813_v6  ;;  %v852_v6 = vmul.f32 %v1833_v26, %v1833_v26  ;;  %v859_v55 = vmul.f32 %v1868_v3, %v1868_v3  ;;  %p1470_p9 = pnand %p1469_p7, %p1674_p12 }
 0x1bc   : > { %v927_v15 = vadd.f32 %v926_v8, %v847_v43  ;;  %v790_v16 = vadd.f32 %v789_v5, %v1818_v10  ;;  %v853_v10 = vmul.f32 %v1838_v30, %v1838_v30  ;;  %v860_v36 = vmul.f32 %v1873_v12, %v1873_v12  ;;  %p1477_p11 = por %p1476_p5, %p1475_p0 }
 0x1bd   : > { %v754_v18 = vadd.f32 %v753_v11, %v1823_v14  ;;  %v891_v21 = vadd.f32 %v890_v9, %v848_v50  ;;  %v854_v14 = vmul.f32 %v1843_v35, %v1843_v35  ;;  %v861_v62 = vmul.f32 %v1878_v17, %v1878_v17  ;;  %p1471_p2 = pneg %p1470_p9 }
 0x1be   : > { %v791_v23 = vadd.f32 %v790_v16, %v1828_v19  ;;  %v928_v24 = vadd.f32 %v927_v15, %v849_v54  ;;  %v855_v19 = vmul.f32 %v1848_v42, %v1848_v42  ;;  %v862_v1 = vmul.f32 %v1883_v22, %v1883_v22 }
 0x1bf   : > { %v755_v25 = vadd.f32 %v754_v18, %v1833_v26  ;;  %v892_v29 = vadd.f32 %v891_v21, %v850_v58  ;;  %v863_v2 = vmul.f32 %v1888_v28, %v1888_v28  ;;  %v864_v43 = vmul.f32 %v1893_v40, %v1893_v40  ;;  %p1478_p1 = pnand %p1477_p11, %p1471_p2 }
 0x1c0   : > { %v792_v31 = vadd.f32 %v791_v23, %v1838_v30  ;;  %v929_v32 = vadd.f32 %v928_v24, %v851_v63  ;;  %v865_v8 = vmul.f32 %v1898_v46, %v1898_v46  ;;  %v866_v9 = vmul.f32 %v1903_v52, %v1903_v52 }
 0x1c1   : > { %v756_v33 = vadd.f32 %v755_v25, %v1843_v35  ;;  %v893_v37 = vadd.f32 %v892_v29, %v852_v6  ;;  %v869_v15 = vmul.f32 %v1922_v13, %v1922_v13  ;;  %v870_v63 = vmul.f32 %v1934_v20, %v1934_v20 }
 0x1c2   : > { %v793_v39 = vadd.f32 %v792_v31, %v1848_v42  ;;  %v930_v34 = vadd.f32 %v929_v32, %v853_v10  ;;  %v946_v29 = vlaneseq }
 0x1c3   : > { %v757_v26 = vadd.f32 %v756_v33, %v1853_v51  ;;  %v894_v44 = vadd.f32 %v893_v37, %v854_v14 }
 0x1c4   : > { %v794_v30 = vadd.f32 %v793_v39, %v1858_v56  ;;  %v931_v47 = vadd.f32 %v930_v34, %v855_v19  ;;  %v947_v19 = vshrl.u32 %v946_v29, 7 }
 0x1c5   : > { %v895_v35 = vadd.f32 %v894_v44, %v856_v41  ;;  %v758_v48 = vadd.f32 %v757_v26, %v1863_v61 }
 0x1c6   : > { %v932_v42 = vadd.f32 %v931_v47, %v857_v45  ;;  %v795_v53 = vadd.f32 %v794_v30, %v1868_v3  ;;  %v948_v45 = vsub.s32 0, %v947_v19 }
 0x1c7   : > { %v896_v51 = vadd.f32 %v895_v35, %v858_v49  ;;  %v759_v57 = vadd.f32 %v758_v48, %v1873_v12 }
 0x1c8   : > { %v933_v56 = vadd.f32 %v932_v42, %v859_v55  ;;  %v796_v59 = vadd.f32 %v795_v53, %v1878_v17 }
 0x1c9   : > { %v897_v0 = vadd.f32 %v896_v51, %v860_v36  ;;  %v760_v61 = vadd.f32 %v759_v57, %v1883_v22 }
 0x1ca   : > { %v934_v38 = vadd.f32 %v933_v56, %v861_v62  ;;  %v797_v3 = vadd.f32 %v796_v59, %v1888_v28  ;;  %v868_v28 = vmul.f32 %v1917_v7, %v1917_v7 }
 0x1cb   : > { %v898_v4 = vadd.f32 %v897_v0, %v862_v1  ;;  %v761_v12 = vadd.f32 %v760_v61, %v1893_v40  ;;  %v867_v40 = vmul.f32 %v1908_v60, %v1908_v60 }
 0x1cc   : > { %v935_v5 = vadd.f32 %v934_v38, %v863_v2  ;;  %v798_v17 = vadd.f32 %v797_v3, %v1898_v46 }
 0x1cd   : > { %v899_v50 = vadd.f32 %v898_v4, %v864_v43  ;;  %v762_v22 = vadd.f32 %v761_v12, %v1903_v52 }
 0x1ce   : > { %v936_v11 = vadd.f32 %v935_v5, %v865_v8  ;;  %v799_v54 = vadd.f32 %v798_v17, %v1908_v60  ;;  %v871_v60 = vmul.f32 %v1946_v27, %v1946_v27 }
 0x1cf   : > { %v900_v16 = vadd.f32 %v899_v50, %v866_v9  ;;  %v763_v46 = vadd.f32 %v762_v22, %v1917_v7 }
 0x1d0   : > { %v937_v58 = vadd.f32 %v936_v11, %v867_v40  ;;  %v800_v18 = vadd.f32 %v799_v54, %v1922_v13 }
 0x1d1   : > { %v901_v21 = vadd.f32 %v900_v16, %v868_v28  ;;  %v764_v52 = vadd.f32 %v763_v46, %v1934_v20 }
 0x1d2   : > { %v938_v23 = vadd.f32 %v937_v58, %v869_v15  ;;  %v801_v24 = vadd.f32 %v800_v18, %v1946_v27 }
 0x1d3   : > { %v765_v6 = vrot.slane %v764_v52, 4  ;;  %v902_v25 = vadd.f32 %v901_v21, %v870_v63 }
 0x1d4   : > { %v802_v7 = vrot.slane %v801_v24, 4  ;;  %v939_v10 = vadd.f32 %v938_v23, %v871_v60 }
 0x1d5   : > { %v766_v31 = vadd.f32 %v765_v6, %v764_v52  ;;  %v903_v13 = vrot.slane %v902_v25, 4 }
 0x1d6   : > { %v803_v32 = vadd.f32 %v802_v7, %v801_v24  ;;  %v940_v14 = vrot.slane %v939_v10, 4 }
 0x1d7   : > { %v767_v33 = vrot.slane %v766_v31, 2  ;;  %v904_v37 = vadd.f32 %v903_v13, %v902_v25 }
 0x1d8   : > { %v804_v20 = vrot.slane %v803_v32, 2  ;;  %v941_v39 = vadd.f32 %v940_v14, %v939_v10 }
 0x1d9   : > { %v768_v34 = vadd.f32 %v767_v33, %v766_v31  ;;  %v905_v26 = vrot.slane %v904_v37, 2 }
 0x1da   : > { %v805_v41 = vadd.f32 %v804_v20, %v803_v32  ;;  %v942_v27 = vrot.slane %v941_v39, 2 }
 0x1db   : > { %v769_v44 = vrot.slane %v768_v34, 1  ;;  %v906_v30 = vadd.f32 %v905_v26, %v904_v37 }
 0x1dc   : > { %v806_v47 = vrot.slane %v805_v41, 1  ;;  %v943_v35 = vadd.f32 %v942_v27, %v941_v39 }
 0x1dd   : > { %v770_v48 = vadd.f32 %v769_v44, %v768_v34  ;;  %v907_v49 = vrot.slane %v906_v30, 1 }
 0x1de   : > { %v807_v42 = vadd.f32 %v806_v47, %v805_v41  ;;  %v944_v53 = vrot.slane %v943_v35, 1 }
 0x1df   : > { %v908_v55 = vadd.f32 %v907_v49, %v906_v30  ;;  %v949_v51 = vrot.slane %v770_v48, %v948_v45 }
 0x1e0   : > { %v945_v57 = vadd.f32 %v944_v53, %v943_v35  ;;  %v953_v36 = vrot.slane %v807_v42, %v948_v45 }
 0x1e1   : > { %v957_v56 = vrot.slane %v908_v55, %v948_v45  ;;  %962 = vst [vmem:[%s248_s8] sm:$0xff] %v949_v51 }
 0x1e2   : > { %v961_v59 = vrot.slane %v945_v57, %v948_v45  ;;  %963 = vst [vmem:[%s248_s8 + $0x8] sm:$0xff] %v953_v36 }
 0x1e3   : > { %964 = vst [vmem:[%s248_s8 + $0x10] sm:$0xff] %v957_v56 }
 0x1e4   : > { %965 = vst [vmem:[%s248_s8 + $0x18] sm:$0xff] %v961_v59 }
 0x1e5   : > { %1481 = shalt.err (!%p1478_p1)
}
 0x1e6   : > { %s1482_s11 = scalar_lea.hbm %s2117_s26, 512  ;;  %s1486_s13 = scalar_lea.hbm %s2167_s4, 1024 }
 0x1e7   : > { %p1483_p4 = scmp.ne.s32.totalorder %s2117_s26, %s1482_s11  ;;  %p1487_p10 = scmp.lt.u32.totalorder %s2117_s26, %s2167_s4 }
 0x1e8   : > { %p1488_p13 = scmp.lt.u32.totalorder %s1486_s13, %s1482_s11  ;;  %p1490_p7 = scmp.lt.u32.totalorder %s1482_s11, %s2117_s26 }
 0x1e9   : > { %p1484_p6 = pnand %p1483_p4, %p1674_p12 }
 0x1ea   : > { %p1489_p3 = por %p1488_p13, %p1487_p10 }
 0x1eb   : > { %p1485_p8 = pneg %p1484_p6 }
 0x1ec   : > { %p1491_p9 = por %p1490_p7, %p1489_p3 }
 0x1ee   : > { %p1492_p2 = pnand %p1491_p9, %p1485_p8 }
 0x1f0   : > { %1495 = shalt.err (!%p1492_p2)
}
 0x1f1   : > { %1248 = dma.vmem_to_hbm [thread:$0]  (%p1674_p12), %s2119_s23, 512, %s2117_s26, %s1989_s29  }
 0x1f2 PF: > { %s1035_s24 = sand.u32 1, %s1530_s15   ;;  %p2182_p0 = scmp.ne.s32.totalorder %s2172_s22, 0 }
 0x1f3   : > { %p2183_p5 = scmp.ge.s32.totalorder %s1542_s18, 2  ;;  %s1036_s8 = scalar_lea.sflag [#allocation4], %s1035_s24 }
 0x1f5   : > { %p1261_p11 = pnand %p2183_p5, %p2182_p0 }
 0x1f7   : > { %1521 = dma.done.wait (!%p1261_p11), %s1036_s8, 4096  }
 0x1f8   : > { %1523 = vsyncadd (!%p1261_p11), %s1036_s8, 4294963200  ;;  %s1044_s14 = sand.u32 1, %s1164_s20  }
 0x1f9   : > { %s1045_s10 = scalar_lea.sflag [#allocation9], %s1044_s14 }
 0x1fa   : > { %1525 = dma.done.wait (!%p1261_p11), %s1045_s10, 4608  }
 0x1fb   : > { %1527 = vsyncadd (!%p1261_p11), %s1045_s10, 4294962688  ;;  %p22_p12 = scmp.ge.s32.totalorder %s1639_s27, 4   ;;  %s2184_s15 = smov %s1534_s16 }
 0x1fc   : > { %s2185_s16 = smov %s1538_s17  ;;  %s2186_s17 = smov %s1670_s30 }
 0x1fd   : > { %s2187_s18 = smov %s1639_s27  ;;  %24 = sbr.rel (!%p22_p12) target bundleno = 8 (0x8), region = 109 }
 0x204   :  { %1059 = vsyncpa [#allocation3], 1 }
 0x205   :  { %1061 = vsyncpa [#allocation3 + $0x1], 1 }
 0x206   :  { %1062 = vsyncpa [#allocation6], 1 }
 0x207   :  { %1063 = vsyncpa [#allocation4], 1 }
 0x208   :  { %1065 = vsyncpa [#allocation4 + $0x1], 1 }
 0x209   :  { %1066 = vsyncpa [#allocation9], 1 }
 0x20a   :  { %1068 = vsyncpa [#allocation9 + $0x1], 1 }

</bundles_post_ra>
